<compile_context>
chip_gen: v7x
topology: tpu7x:2x2x1
jax: 0.10.0
libtpu: 0.0.40
codegen_flags: <defaults>
</compile_context>

<pallas_src>
import functools
from typing import NamedTuple

import jax
import jax.numpy as jnp
from jax.experimental import pallas as pl
from jax.experimental.pallas import tpu as pltpu

_LANE = 128      # minor-dim alignment
_SUBLANE = 16    # row alignment (covers bf16 sublane packing)


def _round_up(a: int, m: int) -> int:
    return ((a + m - 1) // m) * m


def _cdiv(a: int, b: int) -> int:
    return -(-a // b)


def _dtype_bytes(dt) -> int:
    return jnp.dtype(dt).itemsize


def _detect_vmem_limit_bytes() -> int:
    """Generation-aware VMEM budget (~75% of physical, capped at 96 MiB)."""
    phys = None
    try:
        phys = int(pltpu.get_tpu_info().vmem_capacity_bytes)
    except Exception:
        phys = None
    if not phys:
        try:
            kind = jax.devices()[0].device_kind.lower()
        except Exception:
            kind = ""
        # v7x has 64 MiB VMEM per TensorCore; v5e/v6e have 128 MiB.
        phys = (64 << 20) if "v7" in kind else (128 << 20)
    return min(phys * 3 // 4, 96 << 20)


_VMEM_LIMIT = _detect_vmem_limit_bytes()


class EmbeddingPlan(NamedTuple):
    """Static (hashable) tiling plan produced once at parameter-prep time."""
    n_token: int
    d_embed: int
    tk: int
    tn: int
    k_pad: int
    n_pad: int


def prepare_embedding_params(w, b, *, compute_dtype=jnp.bfloat16,
                             tk_cap=2048, tn_cap=1024):
    """One-time canonicalization of the embedding parameters.

    Returns (w_t, b_p, plan) where w_t is W pre-transposed to (k_pad, n_pad)
    in `compute_dtype` and b_p is the bias padded to (1, n_pad) in f32.
    Do this once at init, not per forward call.
    """
    d_embed, n_token = w.shape
    tk = min(tk_cap, _round_up(n_token, _LANE))
    tn = min(tn_cap, _round_up(d_embed, _LANE))
    k_pad = _round_up(n_token, tk)
    n_pad = _round_up(d_embed, tn)
    w_t = jnp.pad(w.T, ((0, k_pad - n_token),
                        (0, n_pad - d_embed))).astype(compute_dtype)
    b_p = jnp.pad(b.astype(jnp.float32), ((0, 0), (0, n_pad - d_embed)))
    return w_t, b_p, EmbeddingPlan(n_token, d_embed, tk, tn, k_pad, n_pad)


def _select_tm(m, tk, tn, *, w_bytes, x_bytes, out_bytes,
               budget_bytes, tm_cap=1024):
    """Pick the M tile; prefer a single M tile so W streams from HBM once."""
    usable = int(budget_bytes * 0.85)                    # Mosaic scratch headroom
    fixed = 2 * tk * tn * w_bytes + 2 * tn * 4           # dbl-buf W tiles + bias
    per_row = 2 * tk * x_bytes + 2 * tn * out_bytes + tn * 4   # x + out dbl-buf + acc
    tm_fit = max(_SUBLANE, ((usable - fixed) // per_row) // _SUBLANE * _SUBLANE)

    m16 = _round_up(m, _SUBLANE)
    if m16 <= tm_fit:
        return m16, m16                                  # single M tile
    tm = min(tm_cap, tm_fit)
    # Rebalance tm to minimize zero-padding waste at the same tile count.
    ntiles = _cdiv(m, tm)
    tm = _round_up(_cdiv(m, ntiles), _SUBLANE)
    return tm, tm * ntiles


def _linear_kernel(x_ref, w_ref, b_ref, o_ref, acc_ref):
    # x_ref: (tm, tk) native dtype, w_ref: (tk, tn) compute dtype,
    # b_ref: (1, tn) f32, o_ref: (tm, tn) out dtype, acc_ref: (tm, tn) f32.
    # Output block index is constant along the K grid axis (last), so the
    # accumulator stays resident across the reduction.
    k = pl.program_id(2)

    @pl.when(k == 0)
    def _init():
        acc_ref[...] = jnp.zeros_like(acc_ref)

    # Cast x on the VPU in-kernel (cheaper in HBM traffic than a wrapper cast).
    acc_ref[...] += jnp.dot(
        x_ref[...].astype(w_ref.dtype), w_ref[...],
        preferred_element_type=jnp.float32,
    )

    @pl.when(k == pl.num_programs(2) - 1)
    def _finalize():
        o_ref[...] = (acc_ref[...] + b_ref[...]).astype(o_ref.dtype)


@functools.partial(jax.jit, static_argnames=("plan",))
def embedding_forward(x, w_t, b_p, plan: EmbeddingPlan):
    """F.linear(x, W, b) with W pre-canonicalized by prepare_embedding_params."""
    n_token, d_embed = plan.n_token, plan.d_embed
    tk, tn, k_pad, n_pad = plan.tk, plan.tn, plan.k_pad, plan.n_pad

    lead = x.shape[:-1]
    out_dtype = x.dtype
    x2d = x.reshape(-1, n_token)
    m = x2d.shape[0]

    tm, m_pad = _select_tm(
        m, tk, tn,
        w_bytes=_dtype_bytes(w_t.dtype),
        x_bytes=_dtype_bytes(x2d.dtype),
        out_bytes=_dtype_bytes(out_dtype),
        budget_bytes=_VMEM_LIMIT,
    )

    # Zero K/M padding is inert: padded W rows are zero and the [:m, :d_embed]
    # slice drops padded outputs.
    x_p = jnp.pad(x2d, ((0, m_pad - m), (0, k_pad - n_token)))

    # N outermost (megacore prefers splitting N -> each TC reads half of W),
    # M in the middle, K (reduction) last and "arbitrary".
    grid = (n_pad // tn, m_pad // tm, k_pad // tk)

    out = pl.pallas_call(
        _linear_kernel,
        out_shape=jax.ShapeDtypeStruct((m_pad, n_pad), out_dtype),
        grid_spec=pltpu.PrefetchScalarGridSpec(
            num_scalar_prefetch=0,
            grid=grid,
            in_specs=[
                pl.BlockSpec((tm, tk), lambda j, i, k: (i, k)),   # x  M/K tile
                pl.BlockSpec((tk, tn), lambda j, i, k: (k, j)),   # Wᵀ K/N tile
                pl.BlockSpec((1, tn), lambda j, i, k: (0, j)),    # bias N tile
            ],
            out_specs=pl.BlockSpec((tm, tn), lambda j, i, k: (i, j)),
            scratch_shapes=[pltpu.VMEM((tm, tn), jnp.float32)],
        ),
        compiler_params=pltpu.CompilerParams(
            dimension_semantics=("parallel", "parallel", "arbitrary"),
            vmem_limit_bytes=_VMEM_LIMIT,
        ),
    )(x_p, w_t, b_p)

    return out[:m, :d_embed].reshape(*lead, d_embed)


if __name__ == "__main__":
    # Small shapes: batch=2, seq=8, n_token (vocab)=32, d_embed=64
    n_token = 32
    d_embed = 64
    batch, seq = 2, 8

    key = jax.random.PRNGKey(0)
    kx, kw = jax.random.split(key)

    # Deterministic parameter init matching the PyTorch module's __init__:
    #   embedding_w ~ U(-0.1, 0.1), shape (d_embed, n_token)
    #   embedding_b = 0,            shape (1, d_embed)
    w = jax.random.uniform(kw, (d_embed, n_token), jnp.float32,
                           minval=-0.1, maxval=0.1)
    b = jnp.zeros((1, d_embed), jnp.float32)

    x = jax.random.normal(kx, (batch, seq, n_token), jnp.float32)

    # One-time parameter canonicalization (transpose + pad + bf16 cast),
    # hoisted out of the per-call forward path.
    w_t, b_p, plan = prepare_embedding_params(w, b)

    out = jax.block_until_ready(embedding_forward(x, w_t, b_p, plan))
    assert out.shape == (batch, seq, d_embed)
    assert out.dtype == x.dtype

    # Tight check against a bf16-input / f32-accumulation reference
    # (matches the kernel's compute dtype).
    x_bf = x.astype(jnp.bfloat16).astype(jnp.float32)
    w_bf = w.astype(jnp.bfloat16).astype(jnp.float32)
    ref_bf16 = x_bf @ w_bf.T + b
    assert jnp.allclose(out, ref_bf16, atol=1e-3, rtol=1e-3), \
        float(jnp.max(jnp.abs(out - ref_bf16)))

    # Loose check against the full-f32 reference (bf16 rounding tolerance).
    ref_f32 = x @ w.T + b
    assert jnp.allclose(out, ref_f32, atol=2e-2, rtol=2e-2), \
        float(jnp.max(jnp.abs(out - ref_f32)))

    print("KERNEL_OK")
</pallas_src>

<mosaic_0001>
module attributes {stable_mosaic.version = 11 : i64} {
  func.func @_linear_kernel(%arg0: i32, %arg1: i32, %arg2: i32, %arg3: memref<16x128xf32, #tpu.memory_space<vmem>>, %arg4: memref<128x128xbf16, #tpu.memory_space<vmem>>, %arg5: memref<1x128xf32, #tpu.memory_space<vmem>>, %arg6: memref<16x128xf32, #tpu.memory_space<vmem>>, %arg7: memref<16x128xf32, #tpu.memory_space<vmem>>) attributes {dimension_semantics = [#tpu.dimension_semantics<parallel>, #tpu.dimension_semantics<parallel>, #tpu.dimension_semantics<arbitrary>], iteration_bounds = array<i64: 1, 1, 1>, scalar_prefetch = 0 : i64, scratch_operands = 1 : i64, tpu.core_type = #tpu.core_type<tc>, window_params = [{transform_indices = @transform_0, window_bounds = array<i64: 16, 128>}, {transform_indices = @transform_1, window_bounds = array<i64: 128, 128>}, {transform_indices = @transform_2, window_bounds = array<i64: 1, 128>}, {transform_indices = @transform_3, window_bounds = array<i64: 16, 128>}]} {
    %c0_i32 = arith.constant 0 : i32
    %0 = arith.cmpi eq, %arg2, %c0_i32 : i32
    %1 = arith.extui %0 : i1 to i32
    %c0_i32_0 = arith.constant 0 : i32
    %2 = arith.cmpi ne, %1, %c0_i32_0 : i32
    scf.if %2 {
      %cst_10 = arith.constant 0.000000e+00 : f32
      %13 = vector.broadcast %cst_10 : f32 to vector<16x128xf32>
      %c0_11 = arith.constant 0 : index
      %c0_12 = arith.constant 0 : index
      %14 = vector.load %arg7[%c0_11, %c0_12] : memref<16x128xf32, #tpu.memory_space<vmem>>, vector<16x128xf32>
      tpu.vector_store %arg7[%c0_11, %c0_12], %13 {strides = array<i32>} : memref<16x128xf32, #tpu.memory_space<vmem>>, vector<16x128xf32>,
    } else {
    }
    %c0 = arith.constant 0 : index
    %c0_1 = arith.constant 0 : index
    %3 = vector.load %arg7[%c0, %c0_1] : memref<16x128xf32, #tpu.memory_space<vmem>>, vector<16x128xf32>
    %c0_2 = arith.constant 0 : index
    %c0_3 = arith.constant 0 : index
    %4 = vector.load %arg3[%c0_2, %c0_3] : memref<16x128xf32, #tpu.memory_space<vmem>>, vector<16x128xf32>
    %5 = arith.truncf %4 : vector<16x128xf32> to vector<16x128xbf16>
    %c0_4 = arith.constant 0 : index
    %c0_5 = arith.constant 0 : index
    %6 = vector.load %arg4[%c0_4, %c0_5] : memref<128x128xbf16, #tpu.memory_space<vmem>>, vector<128x128xbf16>
    %cst = arith.constant dense<0.000000e+00> : vector<16x128xf32>
    %7 = tpu.matmul %5, %6, %cst {dimension_numbers = #tpu.dot_dimension_numbers<[1], [0], [0], [1], [0, 0, 1, 1], [], []>} : vector<16x128xbf16>, vector<128x128xbf16>, vector<16x128xf32> -> vector<16x128xf32>
    %8 = arith.addf %3, %7 : vector<16x128xf32>
    %c0_6 = arith.constant 0 : index
    %c0_7 = arith.constant 0 : index
    %9 = vector.load %arg7[%c0_6, %c0_7] : memref<16x128xf32, #tpu.memory_space<vmem>>, vector<16x128xf32>
    tpu.vector_store %arg7[%c0_6, %c0_7], %8 {strides = array<i32>} : memref<16x128xf32, #tpu.memory_space<vmem>>, vector<16x128xf32>,
    %c0_i32_8 = arith.constant 0 : i32
    %10 = arith.cmpi eq, %arg2, %c0_i32_8 : i32
    %11 = arith.extui %10 : i1 to i32
    %c0_i32_9 = arith.constant 0 : i32
    %12 = arith.cmpi ne, %11, %c0_i32_9 : i32
    scf.if %12 {
      %c0_10 = arith.constant 0 : index
      %c0_11 = arith.constant 0 : index
      %13 = vector.load %arg7[%c0_10, %c0_11] : memref<16x128xf32, #tpu.memory_space<vmem>>, vector<16x128xf32>
      %c0_12 = arith.constant 0 : index
      %c0_13 = arith.constant 0 : index
      %14 = vector.load %arg5[%c0_12, %c0_13] : memref<1x128xf32, #tpu.memory_space<vmem>>, vector<1x128xf32>
      %15 = vector.broadcast %14 : vector<1x128xf32> to vector<16x128xf32>
      %16 = arith.addf %13, %15 : vector<16x128xf32>
      %c0_14 = arith.constant 0 : index
      %c0_15 = arith.constant 0 : index
      %17 = vector.load %arg6[%c0_14, %c0_15] : memref<16x128xf32, #tpu.memory_space<vmem>>, vector<16x128xf32>
      tpu.vector_store %arg6[%c0_14, %c0_15], %16 {strides = array<i32>} : memref<16x128xf32, #tpu.memory_space<vmem>>, vector<16x128xf32>,
    } else {
    }
    return
  }
  func.func @transform_0(%arg0: i32, %arg1: i32, %arg2: i32) -> (i32, i32) {
    %c0_i32 = arith.constant 0 : i32
    return %arg1, %arg2 : i32, i32
  }
  func.func @transform_1(%arg0: i32, %arg1: i32, %arg2: i32) -> (i32, i32) {
    %c0_i32 = arith.constant 0 : i32
    return %arg2, %arg0 : i32, i32
  }
  func.func @transform_2(%arg0: i32, %arg1: i32, %arg2: i32) -> (i32, i32) {
    %c0_i32 = arith.constant 0 : i32
    %c0_i32_0 = arith.constant 0 : i32
    return %c0_i32, %arg0 : i32, i32
  }
  func.func @transform_3(%arg0: i32, %arg1: i32, %arg2: i32) -> (i32, i32) {
    %c0_i32 = arith.constant 0 : i32
    return %arg1, %arg0 : i32, i32
  }
}

</mosaic_0001>

<bundles_post_ra>
// kernel: embedding_forward.1
= control target key start
LH: loop header
LB: loop body
LE: loop exit
PB: predicated region body
PF: predicated region fallthrough
CT: control target
= control target key end

     0   :  { %8 = vsyncpa [#allocation4], 0  ;;  %s443_s0 = inlined_call_operand.hbm [shape: f32[16,128], index: 0, kind: input, shape index: {}]   ;;  %s444_s1 = inlined_call_operand.hbm [shape: bf16[128,128], index: 1, kind: input, shape index: {}]   ;;  %s445_s2 = inlined_call_operand.hbm [shape: f32[1,128], index: 2, kind: input, shape index: {}]   ;;  %s446_s3 = inlined_call_operand.hbm [shape: f32[16,128], index: 3, kind: output, shape index: {}]  }
   0x1   :  { %9 = vsyncpa [#allocation7], 0 }
   0x2   :  { %10 = vsyncpa [#allocation5], 0  ;;  %s359_s12 = smov [#allocation6]   ;;  %s265_s16 = scalar_lea.hbm %s444_s1, 1024 }
   0x3   :  { %s28_s13 = sshll.u32 %s359_s12, 4  ;;  %p266_p0 = scmp.ne.s32.totalorder %s444_s1, %s265_s16  ;;  %s29_s13 = int_to_ptr.vmem [resolvable:$true] %s28_s13 }
   0x4   :  { %p269_p1 = scmp.lt.u32.totalorder %s265_s16, %s444_s1 }
   0x6   :  { %p271_p2 = pnand %p269_p1, %p266_p0 }
   0x8   :  { %274 = shalt.err (!%p271_p2)
}
   0x9   :  { %s275_s21 = scalar_lea.vmem %s29_s13, 1024  ;;  %p280_p4 = scmp.lt.s32.totalorder %s29_s13, %s29_s13 }
   0xa   :  { %p276_p3 = scmp.ne.s32.totalorder %s29_s13, %s275_s21  ;;  %p281_p5 = scmp.lt.s32.totalorder %s275_s21, %s275_s21 }
   0xc   :  { %p282_p6 = por %p281_p5, %p280_p4 }
   0xe   :  { %p283_p7 = pnand %p282_p6, %p276_p3 }
  0x10   :  { %286 = shalt.err (!%p283_p7)
}
  0x11   :  { %s360_s22 = smov 64   ;;  %s361_s23 = smov 4  }
  0x12   :  { %34 = dma.hbm_to_vmem [thread:$0]  %s444_s1, 1024, %s29_s13, [#allocation7], %s360_s22, %s360_s22, %s361_s23  }
  0x13   :  { %s362_s26 = smov [#allocation3]   ;;  %s287_s30 = scalar_lea.hbm %s443_s0, 256 }
  0x14   :  { %s16_s27 = sshll.u32 %s362_s26, 4  ;;  %p288_p8 = scmp.ne.s32.totalorder %s443_s0, %s287_s30  ;;  %s17_s27 = int_to_ptr.vmem [resolvable:$true] %s16_s27 }
  0x15   :  { %p291_p9 = scmp.lt.u32.totalorder %s287_s30, %s443_s0 }
  0x17   :  { %p293_p10 = pnand %p291_p9, %p288_p8 }
  0x19   :  { %296 = shalt.err (!%p293_p10)
}
  0x1a   :  { %s297_s8 = scalar_lea.vmem %s17_s27, 256  ;;  %p302_p12 = scmp.lt.s32.totalorder %s17_s27, %s17_s27 }
  0x1b   :  { %p298_p11 = scmp.ne.s32.totalorder %s17_s27, %s297_s8  ;;  %p303_p13 = scmp.lt.s32.totalorder %s297_s8, %s297_s8 }
  0x1d   :  { %p304_p0 = por %p303_p13, %p302_p12 }
  0x1f   :  { %p305_p1 = pnand %p304_p0, %p298_p11 }
  0x21   :  { %308 = shalt.err (!%p305_p1)
}
  0x22   :  { %s363_s1 = smov 128   ;;  %s364_s9 = smov 8  }
  0x23   :  { %22 = dma.hbm_to_vmem [thread:$0]  %s443_s0, 256, %s17_s27, [#allocation4], %s363_s1, %s363_s1, %s364_s9  }
  0x24   :  { %s365_s12 = smov [#allocation8]   ;;  %s309_s16 = scalar_lea.hbm %s445_s2, 16 }
  0x25   :  { %s41_s13 = sshll.u32 %s365_s12, 4  ;;  %p310_p2 = scmp.ne.s32.totalorder %s445_s2, %s309_s16  ;;  %s42_s13 = int_to_ptr.vmem [resolvable:$true] %s41_s13 }
  0x26   :  { %p313_p3 = scmp.lt.u32.totalorder %s309_s16, %s445_s2 }
  0x28   :  { %p315_p4 = pnand %p313_p3, %p310_p2 }
  0x2a   :  { %318 = shalt.err (!%p315_p4)
}
  0x2b   :  { %s319_s21 = scalar_lea.vmem %s42_s13, 16  ;;  %s323_s0 = scalar_lea.vmem %s42_s13, 32 }
  0x2c   :  { %p320_p5 = scmp.ne.s32.totalorder %s42_s13, %s319_s21  ;;  %p324_p6 = scmp.lt.s32.totalorder %s42_s13, %s42_s13 }
  0x2d   :  { %p325_p7 = scmp.lt.s32.totalorder %s323_s0, %s319_s21 }
  0x2f   :  { %p326_p8 = por %p325_p7, %p324_p6 }
  0x31   :  { %p327_p9 = pnand %p326_p8, %p320_p5 }
  0x33   :  { %330 = shalt.err (!%p327_p9)
}
  0x34   :  { %44 = dma.hbm_to_vmem [thread:$0]  %s445_s2, 16, %s42_s13, [#allocation7]  }
  0x35   :  { %353 = dma.done.wait [#allocation4], 256  }
  0x36   :  { %354 = vsyncadd [#allocation4], 4294967040 }
  0x37   :  { %355 = dma.done.wait [#allocation7], 1040  }
  0x38   :  { %356 = vsyncadd [#allocation7], 4294966256  ;;  %v366_v0 = vmov 0.0   ;;  %vm367_vm0 = vmmov 0   ;;  %v257_v1 = vld [vmem:[#allocation6] sm:$0xff]   ;;  %v258_v2 = vld [vmem:[#allocation6 + $0x8] sm:$0xff]  }
  0x39   :  { %227 = vmatprep.subr.bf16.mxu0 %v366_v0  ;;  %243 = vmatprep.mubr.msk.bf16.mxu0 %vm367_vm0, %v366_v0  ;;  %v259_v3 = vld [vmem:[#allocation6 + $0x10] sm:$0xff]   ;;  %v260_v4 = vld [vmem:[#allocation6 + $0x18] sm:$0xff]   ;;  %v261_v5 = vld [vmem:[#allocation6 + $0x20] sm:$0xff]   ;;  %s368_s2 = smov [#allocation9]  }
  0x3a   :  { %228 = vmatpush3.bf16.msra.mxu0 %v257_v1  ;;  %v262_v6 = vld [vmem:[#allocation6 + $0x28] sm:$0xff]   ;;  %v263_v7 = vld [vmem:[#allocation6 + $0x30] sm:$0xff]   ;;  %v264_v8 = vld [vmem:[#allocation6 + $0x38] sm:$0xff]   ;;  %s196_s24 = sshll.u32 %s368_s2, 4  ;;  %s197_s24 = int_to_ptr.vmem [resolvable:$true] %s196_s24 }
  0x3b   :  { %229 = vmatprep.subr.bf16.mxu0 %v366_v0  ;;  %v63_v9 = vld [vmem:[#allocation3] sm:$0xff]  ;;  %v64_v10 = vld [vmem:[#allocation3 + $0x8] sm:$0xff]  ;;  %v217_v12 = vld [vmem:[#allocation8] ss:$0 sm:$0xff]  ;;  %s331_s25 = scalar_lea.vmem %s197_s24, 256  ;;  %p336_p11 = scmp.lt.s32.totalorder %s197_s24, %s197_s24 }
  0x3c   :  { %v65_v11 = vpack.c.bf16 %v64_v10, %v63_v9  ;;  %p332_p10 = scmp.ne.s32.totalorder %s197_s24, %s331_s25  ;;  %p337_p12 = scmp.lt.s32.totalorder %s331_s25, %s331_s25 }
  0x3e   :  { %230 = vmatpush3.bf16.msra.mxu0 %v258_v2  ;;  %p338_p13 = por %p337_p12, %p336_p11 }
  0x3f   :  { %231 = vmatprep.subr.bf16.mxu0 %v366_v0 }
  0x40   :  { %p339_p0 = pnand %p338_p13, %p332_p10 }
  0x42   :  { %232 = vmatpush3.bf16.msra.mxu0 %v259_v3 }
  0x43   :  { %233 = vmatprep.subr.bf16.mxu0 %v366_v0 }
  0x46   :  { %234 = vmatpush3.bf16.msra.mxu0 %v260_v4 }
  0x47   :  { %235 = vmatprep.subr.bf16.mxu0 %v366_v0 }
  0x4a   :  { %236 = vmatpush3.bf16.msra.mxu0 %v261_v5 }
  0x4b   :  { %237 = vmatprep.subr.bf16.mxu0 %v366_v0 }
  0x4e   :  { %238 = vmatpush3.bf16.msra.mxu0 %v262_v6 }
  0x4f   :  { %239 = vmatprep.subr.bf16.mxu0 %v366_v0 }
  0x52   :  { %240 = vmatpush3.bf16.msra.mxu0 %v263_v7 }
  0x53   :  { %241 = vmatprep.subr.bf16.mxu0 %v366_v0 }
  0x56   :  { %242 = vmatpush3.bf16.msra.mxu0 %v264_v8 }
  0x59   :  { %244 = vmatmul.mubr.bf16.vlgmr.msra.gmra.mrb[0].mxu0 %v65_v11 }
 0x12c   :  { %v164_v13 = vpop.f32.mrb[0].mxu0 }
 0x12d   :  { %v187_v14 = vadd.f32 %v217_v12, %v164_v13  ;;  %v245_v15 = vpop.f32.mrb[1].mxu0 }
 0x12e   :  { %v167_v16 = vpop.f32.mrb[2].mxu0 }
 0x12f   :  { %189 = vst [vmem:[#allocation9] sm:$0xff] %v187_v14  ;;  %v188_v17 = vadd.f32 %v217_v12, %v167_v16  ;;  %v246_v18 = vpop.f32.mrb[3].mxu0 }
 0x131   :  { %190 = vst [vmem:[#allocation9 + $0x8] sm:$0xff] %v188_v17 }
 0x132   :  { %342 = shalt.err (!%p339_p0)
}
 0x133   :  { %s343_s28 = scalar_lea.hbm %s446_s3, 256 }
 0x134   :  { %p344_p1 = scmp.ne.s32.totalorder %s446_s3, %s343_s28  ;;  %p347_p2 = scmp.lt.u32.totalorder %s343_s28, %s446_s3 }
 0x136   :  { %p349_p3 = pnand %p347_p2, %p344_p1 }
 0x138   :  { %352 = shalt.err (!%p349_p3)
}
 0x139   :  { %202 = dma.vmem_to_hbm [thread:$0]  %s197_s24, 256, %s446_s3, [#allocation5], %s363_s1, %s363_s1, %s364_s9  }
 0x13a   :  { %357 = dma.done.wait [#allocation5], 256  }
 0x13b   :  { %358 = vsyncadd [#allocation5], 4294967040 }
 0x13c   :  { %206 = vsyncpa [#allocation4], 1 }
 0x13d   :  { %207 = vsyncpa [#allocation7], 1 }
 0x13e   :  { %208 = vsyncpa [#allocation5], 1 }

</bundles_post_ra>
